<compile_context>
chip_gen: v7x
topology: tpu7x:2x2x1
jax: 0.10.0
libtpu: 0.0.40
codegen_flags: <defaults>
</compile_context>

<pallas_src>
import functools

import jax
import jax.numpy as jnp
from jax.experimental import pallas as pl
from jax.experimental.pallas import tpu as pltpu


def _norm_kernel(x_ref, alpha_ref, bias_ref, o_ref, *, eps, d_model):
    # x tile: (row_tile, d_model). Accumulate in f32 (no-op for f32 inputs).
    x = x_ref[...].astype(jnp.float32)
    s = jnp.sum(x, axis=-1, keepdims=True)            # XLU reduce
    sq = jnp.sum(x * x, axis=-1, keepdims=True)       # XLU reduce (independent of s)
    mean = s * (1.0 / d_model)
    # torch.std uses the unbiased (N-1) estimator; eps is added to std.
    # One-pass variance: (sum(x^2) - sum(x)*mean) / (N-1), clamped >= 0 against
    # tiny negative values from cancellation.
    var = jnp.maximum(sq - s * mean, 0.0) * (1.0 / (d_model - 1))
    std = jnp.sqrt(var)
    # Exact reciprocal (EUP slot); operand is (row_tile, 1) so cost is noise,
    # and approx=False keeps bit-level parity with a plain divide in f32.
    inv = pl.reciprocal(std + eps, approx=False)
    centered = x - mean
    alpha = alpha_ref[...].astype(jnp.float32)         # (1, d_model)
    bias = bias_ref[...].astype(jnp.float32)           # (1, d_model)
    o_ref[...] = (centered * (inv * alpha) + bias).astype(o_ref.dtype)


def _round_up(x, m):
    return ((x + m - 1) // m) * m


def _vmem_capacity_bytes():
    try:
        info = pltpu.get_tpu_info()
        cap = int(getattr(info, "vmem_capacity_bytes", 0))
        if cap > 0:
            return cap
    except Exception:
        pass
    return 64 * 1024 * 1024  # conservative default (v7x-sized VMEM)


def _num_tensorcores():
    try:
        kind = jax.devices()[0].device_kind.lower()
        if "v7" in kind:
            return 2
    except Exception:
        pass
    return 1


def norm_layer(x, alpha, bias, eps=1e-6, *, row_tile=None):
    """NormLayer forward. x: (..., d_model); alpha/bias: (d_model,)."""
    orig_shape = x.shape
    d_model = orig_shape[-1]
    assert d_model > 1, "d_model must be > 1 (unbiased std divides by N-1)"

    x2 = x.reshape(-1, d_model)
    rows = x2.shape[0]
    itemsize = jnp.dtype(x.dtype).itemsize
    # Sublane packing: 8 rows for 32-bit, 16 for 16-bit, 32 for 8-bit dtypes.
    sublane = max(8, 32 // itemsize)

    # Chip-aware sizing: big-VMEM chips (v5e/v6e, 128 MiB) get ~12 MiB stream
    # tiles and up to 96 MiB scoped VMEM; 64-MiB-VMEM chips (v7x) get ~6 MiB
    # tiles and a ~48 MiB budget that accounts for the f32 temporaries.
    vmem_cap = _vmem_capacity_bytes()
    big_vmem = vmem_cap >= 100 * 1024 * 1024
    if big_vmem:
        target_bytes = 12 * 1024 * 1024
        budget = 96 * 1024 * 1024
    else:
        target_bytes = 6 * 1024 * 1024
        budget = 48 * 1024 * 1024

    per_row_stream = d_model * itemsize
    # Double-buffered input + output tiles (input dtype) + ~3 full-width f32
    # temporaries inside the kernel body (x_f32, x*x / centered, output temp).
    per_row_budget = d_model * (4 * itemsize + 3 * 4)

    if row_tile is None:
        rt = min(target_bytes // per_row_stream, budget // per_row_budget)
        rt = max(sublane, (rt // sublane) * sublane)
        # Never larger than the whole (sublane-rounded) problem.
        rt = min(rt, _round_up(rows, sublane))
        if _num_tensorcores() > 1:
            # Multi-TC (v7x): keep >= ~8 grid steps so each core pipelines
            # several tiles, but never shrink below a ~2 MiB tile.
            floor_rows = max(
                sublane,
                ((2 * 1024 * 1024) // per_row_stream // sublane) * sublane)
            steps_rows = _round_up(pl.cdiv(rows, 8), sublane)
            rt = min(rt, max(floor_rows, steps_rows))
        row_tile = rt
    row_tile = max(sublane, (row_tile // sublane) * sublane)

    alpha2 = alpha.reshape(1, d_model)
    bias2 = bias.reshape(1, d_model)

    tile_bytes = row_tile * d_model * itemsize
    f32_tile_bytes = row_tile * d_model * 4
    vmem_limit = int(min(
        budget,
        max(32 * 1024 * 1024,
            4 * tile_bytes + 3 * f32_tile_bytes + 4 * 1024 * 1024)))

    kernel = functools.partial(_norm_kernel, eps=eps, d_model=d_model)

    # Ragged rows: grid = cdiv(rows, row_tile); Pallas masks the partial last
    # block's stores, so garbage tail rows (per-row independent) are dropped.
    grid = (pl.cdiv(rows, row_tile),)

    out = pl.pallas_call(
        kernel,
        out_shape=jax.ShapeDtypeStruct((rows, d_model), x.dtype),
        grid_spec=pltpu.PrefetchScalarGridSpec(
            num_scalar_prefetch=0,
            grid=grid,
            in_specs=[
                pl.BlockSpec((row_tile, d_model), lambda i: (i, 0)),
                pl.BlockSpec((1, d_model), lambda i: (0, 0)),
                pl.BlockSpec((1, d_model), lambda i: (0, 0)),
            ],
            out_specs=pl.BlockSpec((row_tile, d_model), lambda i: (i, 0)),
        ),
        compiler_params=pltpu.CompilerParams(
            dimension_semantics=("parallel",),
            vmem_limit_bytes=vmem_limit,
        ),
    )(x2, alpha2, bias2)

    return out.reshape(orig_shape)


def _reference(x, alpha, bias, eps):
    d_model = x.shape[-1]
    mean = x.mean(axis=-1, keepdims=True)
    std = jnp.sqrt(jnp.sum((x - mean) ** 2, axis=-1, keepdims=True) / (d_model - 1))
    return alpha * (x - mean) / (std + eps) + bias


if __name__ == "__main__":
    key = jax.random.PRNGKey(0)

    # Small but lane-dense shape (d_model multiple of 128).
    batch, seq, d_model = 2, 8, 128
    k1, k2 = jax.random.split(key)
    x = jax.random.normal(k1, (batch, seq, d_model), dtype=jnp.float32)
    # nn.Parameter(torch.ones(d)) / torch.zeros(d)
    alpha = jnp.ones((d_model,), dtype=jnp.float32)
    bias = jnp.zeros((d_model,), dtype=jnp.float32)

    out = norm_layer(x, alpha, bias, eps=1e-6)
    out = jax.block_until_ready(out)
    ref = _reference(x, alpha, bias, 1e-6)
    assert jnp.allclose(out, ref, atol=1e-5, rtol=1e-5), "mismatch vs reference (case 1)"

    # Exercise the ragged-row path (rows = 3*5 = 15, not a multiple of the tile).
    x2 = jax.random.normal(k2, (3, 5, d_model), dtype=jnp.float32)
    out2 = jax.block_until_ready(norm_layer(x2, alpha, bias, eps=1e-6))
    ref2 = _reference(x2, alpha, bias, 1e-6)
    assert jnp.allclose(out2, ref2, atol=1e-5, rtol=1e-5), "mismatch vs reference (case 2)"

    print("KERNEL_OK")
</pallas_src>

<mosaic_0001>
module attributes {stable_mosaic.version = 11 : i64} {
  func.func @_norm_kernel(%arg0: i32, %arg1: memref<16x128xf32, #tpu.memory_space<vmem>>, %arg2: memref<1x128xf32, #tpu.memory_space<vmem>>, %arg3: memref<1x128xf32, #tpu.memory_space<vmem>>, %arg4: memref<16x128xf32, #tpu.memory_space<vmem>>) attributes {dimension_semantics = [#tpu.dimension_semantics<parallel>], iteration_bounds = array<i64: 1>, scalar_prefetch = 0 : i64, scratch_operands = 0 : i64, tpu.core_type = #tpu.core_type<tc>, window_params = [{transform_indices = @transform_0, window_bounds = array<i64: 16, 128>}, {pipeline_mode = #tpu.pipeline_mode<synchronous>, transform_indices = @transform_1, window_bounds = array<i64: 1, 128>}, {pipeline_mode = #tpu.pipeline_mode<synchronous>, transform_indices = @transform_2, window_bounds = array<i64: 1, 128>}, {transform_indices = @transform_3, window_bounds = array<i64: 16, 128>}]} {
    %c0 = arith.constant 0 : index
    %c0_0 = arith.constant 0 : index
    %0 = vector.load %arg1[%c0, %c0_0] : memref<16x128xf32, #tpu.memory_space<vmem>>, vector<16x128xf32>
    %cst = arith.constant dense<0.000000e+00> : vector<16xf32>
    %1 = vector.multi_reduction <add>, %0, %cst [1] : vector<16x128xf32> to vector<16xf32>
    %2 = vector.shape_cast %1 : vector<16xf32> to vector<16x1xf32>
    %3 = arith.mulf %0, %0 : vector<16x128xf32>
    %cst_1 = arith.constant dense<0.000000e+00> : vector<16xf32>
    %4 = vector.multi_reduction <add>, %3, %cst_1 [1] : vector<16x128xf32> to vector<16xf32>
    %5 = vector.shape_cast %4 : vector<16xf32> to vector<16x1xf32>
    %cst_2 = arith.constant 7.812500e-03 : f32
    %6 = vector.broadcast %cst_2 : f32 to vector<16x1xf32>
    %7 = arith.mulf %2, %6 : vector<16x1xf32>
    %8 = arith.mulf %2, %7 : vector<16x1xf32>
    %9 = arith.subf %5, %8 : vector<16x1xf32>
    %cst_3 = arith.constant 0.000000e+00 : f32
    %10 = vector.broadcast %cst_3 : f32 to vector<16x1xf32>
    %11 = arith.maximumf %9, %10 : vector<16x1xf32>
    %cst_4 = arith.constant 0.00787401571 : f32
    %12 = vector.broadcast %cst_4 : f32 to vector<16x1xf32>
    %13 = arith.mulf %11, %12 : vector<16x1xf32>
    %14 = math.sqrt %13 : vector<16x1xf32>
    %cst_5 = arith.constant 9.99999997E-7 : f32
    %15 = vector.broadcast %cst_5 : f32 to vector<16x1xf32>
    %16 = arith.addf %14, %15 : vector<16x1xf32>
    %17 = tpu.reciprocal %16 : vector<16x1xf32> -> vector<16x1xf32>
    %18 = vector.broadcast %7 : vector<16x1xf32> to vector<16x128xf32>
    %19 = arith.subf %0, %18 : vector<16x128xf32>
    %c0_6 = arith.constant 0 : index
    %c0_7 = arith.constant 0 : index
    %20 = vector.load %arg2[%c0_6, %c0_7] : memref<1x128xf32, #tpu.memory_space<vmem>>, vector<1x128xf32>
    %c0_8 = arith.constant 0 : index
    %c0_9 = arith.constant 0 : index
    %21 = vector.load %arg3[%c0_8, %c0_9] : memref<1x128xf32, #tpu.memory_space<vmem>>, vector<1x128xf32>
    %22 = vector.broadcast %17 : vector<16x1xf32> to vector<16x128xf32>
    %23 = vector.broadcast %20 : vector<1x128xf32> to vector<16x128xf32>
    %24 = arith.mulf %22, %23 : vector<16x128xf32>
    %25 = arith.mulf %19, %24 : vector<16x128xf32>
    %26 = vector.broadcast %21 : vector<1x128xf32> to vector<16x128xf32>
    %27 = arith.addf %25, %26 : vector<16x128xf32>
    %c0_10 = arith.constant 0 : index
    %c0_11 = arith.constant 0 : index
    %28 = vector.load %arg4[%c0_10, %c0_11] : memref<16x128xf32, #tpu.memory_space<vmem>>, vector<16x128xf32>
    tpu.vector_store %arg4[%c0_10, %c0_11], %27 {strides = array<i32>} : memref<16x128xf32, #tpu.memory_space<vmem>>, vector<16x128xf32>,
    return
  }
  func.func @transform_0(%arg0: i32) -> (i32, i32) {
    %c0_i32 = arith.constant 0 : i32
    %c0_i32_0 = arith.constant 0 : i32
    return %arg0, %c0_i32 : i32, i32
  }
  func.func @transform_1(%arg0: i32) -> (i32, i32) {
    %c0_i32 = arith.constant 0 : i32
    %c0_i32_0 = arith.constant 0 : i32
    %c0_i32_1 = arith.constant 0 : i32
    return %c0_i32, %c0_i32_0 : i32, i32
  }
  func.func @transform_2(%arg0: i32) -> (i32, i32) {
    %c0_i32 = arith.constant 0 : i32
    %c0_i32_0 = arith.constant 0 : i32
    %c0_i32_1 = arith.constant 0 : i32
    return %c0_i32, %c0_i32_0 : i32, i32
  }
  func.func @transform_3(%arg0: i32) -> (i32, i32) {
    %c0_i32 = arith.constant 0 : i32
    %c0_i32_0 = arith.constant 0 : i32
    return %arg0, %c0_i32 : i32, i32
  }
}

</mosaic_0001>

<bundles_post_ra>
// kernel: tpu_custom_call.1
= control target key start
LH: loop header
LB: loop body
LE: loop exit
PB: predicated region body
PF: predicated region fallthrough
CT: control target
= control target key end

     0   :  { %8 = vsyncpa [#allocation3], 0  ;;  %s232_s0 = inlined_call_operand.hbm [shape: f32[16,128], index: 0, kind: input, shape index: {}]   ;;  %s233_s1 = inlined_call_operand.vmem [shape: f32[1,128], index: 1, kind: input, shape index: {}]   ;;  %s234_s2 = inlined_call_operand.vmem [shape: f32[1,128], index: 2, kind: input, shape index: {}]   ;;  %s235_s3 = inlined_call_operand.hbm [shape: f32[16,128], index: 3, kind: output, shape index: {}]  }
   0x1   :  { %9 = vsyncpa [#allocation4], 0  ;;  %s172_s12 = smov [#allocation2]   ;;  %s124_s16 = scalar_lea.hbm %s232_s0, 256 }
   0x2   :  { %s15_s13 = sshll.u32 %s172_s12, 4  ;;  %p125_p0 = scmp.ne.s32.totalorder %s232_s0, %s124_s16  ;;  %s16_s13 = int_to_ptr.vmem [resolvable:$true] %s15_s13 }
   0x3   :  { %p128_p1 = scmp.lt.u32.totalorder %s124_s16, %s232_s0 }
   0x5   :  { %p130_p2 = pnand %p128_p1, %p125_p0 }
   0x7   :  { %133 = shalt.err (!%p130_p2)
}
   0x8   :  { %s134_s21 = scalar_lea.vmem %s16_s13, 256  ;;  %p139_p4 = scmp.lt.s32.totalorder %s16_s13, %s16_s13 }
   0x9   :  { %p135_p3 = scmp.ne.s32.totalorder %s16_s13, %s134_s21  ;;  %p140_p5 = scmp.lt.s32.totalorder %s134_s21, %s134_s21 }
   0xb   :  { %p141_p6 = por %p140_p5, %p139_p4 }
   0xd   :  { %p142_p7 = pnand %p141_p6, %p135_p3 }
   0xf   :  { %145 = shalt.err (!%p142_p7)
}
  0x10   :  { %s173_s22 = smov 128   ;;  %s174_s23 = smov 8  }
  0x11   :  { %21 = dma.hbm_to_vmem [thread:$0]  %s232_s0, 256, %s16_s13, [#allocation3], %s173_s22, %s173_s22, %s174_s23  }
  0x12   :  { %168 = dma.done.wait [#allocation3], 256  }
  0x13   :  { %169 = vsyncadd [#allocation3], 4294967040  ;;  %v29_v0 = vld [vmem:[#allocation2] sm:$0xff]  ;;  %v30_v2 = vld [vmem:[#allocation2 + $0x8] sm:$0xff]  ;;  %s175_s29 = smov [#allocation5]  }
  0x14   :  { %31 = vadd.xlane.f32.xlu0 %v29_v0  ;;  %v35_v1 = vmul.f32 %v29_v0, %v29_v0  ;;  %v36_v3 = vmul.f32 %v30_v2, %v30_v2  ;;  %v110_v30 = vld [vmem:[%s233_s1] ss:$0 sm:$0xff]  ;;  %s98_s30 = sshll.u32 %s175_s29, 4  ;;  %s99_s30 = int_to_ptr.vmem [resolvable:$true] %s98_s30 }
  0x15   :  { %v111_v34 = vld [vmem:[%s234_s2] ss:$0 sm:$0xff]  ;;  %s146_s1 = scalar_lea.vmem %s99_s30, 256  ;;  %p151_p9 = scmp.lt.s32.totalorder %s99_s30, %s99_s30 }
  0x16   :  { %37 = vadd.xlane.f32.xlu1 %v35_v1  ;;  %p147_p8 = scmp.ne.s32.totalorder %s99_s30, %s146_s1  ;;  %p152_p10 = scmp.lt.s32.totalorder %s146_s1, %s146_s1 }
  0x18   :  { %33 = vadd.xlane.f32.xlu0 %v30_v2  ;;  %p153_p11 = por %p152_p10, %p151_p9 }
  0x1a   :  { %39 = vadd.xlane.f32.xlu1 %v36_v3  ;;  %p154_p12 = pnand %p153_p11, %p147_p8 }
  0xa1   :  { %v32_v4 = vpop.xlane.xlu0 %31 }
  0xa2   :  { %v41_v5 = vmul.f32 0.0078125, %v32_v4 }
  0xa3   :  { %v38_v6 = vpop.xlane.xlu1 %37 }
  0xa4   :  { %v43_v7 = vmul.f32 %v41_v5, %v32_v4  ;;  %v69_v32 = vsub.f32 %v29_v0, %v41_v5 }
  0xa5   :  { %v34_v8 = vpop.xlane.xlu0 %33 }
  0xa6   :  { %v42_v9 = vmul.f32 0.0078125, %v34_v8  ;;  %v45_v10 = vsub.f32 %v38_v6, %v43_v7 }
  0xa7   :  { %v40_v11 = vpop.xlane.xlu1 %39 }
  0xa8   :  { %v44_v12 = vmul.f32 %v42_v9, %v34_v8  ;;  %v47_v13 = vmax.f32 %v45_v10, 0.0  ;;  %v70_v38 = vsub.f32 %v30_v2, %v42_v9 }
  0xaa   :  { %v49_v14 = vmul.f32 0.007874016, %v47_v13  ;;  %v46_v15 = vsub.f32 %v40_v11, %v44_v12 }
  0xac   :  { %116 = vrsqrt.f32 %v49_v14  ;;  %v48_v16 = vmax.f32 %v46_v15, 0.0  ;;  %vm53_vm0 = vcmp.eq.f32.partialorder %v49_v14, inf  ;;  %v56_v20 = vand.u32 2147483648, %v49_v14 }
  0xad   :  { %vm55_vm1 = vcmp.eq.f32.partialorder %v49_v14, 0.0 }
  0xae   :  { %v50_v17 = vmul.f32 0.007874016, %v48_v16 }
  0xb0   :  { %118 = vrsqrt.f32 %v50_v17  ;;  %vm60_vm2 = vcmp.eq.f32.partialorder %v50_v17, inf  ;;  %v63_v26 = vand.u32 2147483648, %v50_v17  ;;  %vm62_vm3 = vcmp.eq.f32.partialorder %v50_v17, 0.0 }
  0xb6   :  { %v117_v18 = vpop.eup %116 }
  0xb7   :  { %v52_v19 = vmul.f32 %v117_v18, %v49_v14 }
  0xb9   :  { %v54_v21 = vsel %vm53_vm0, %v49_v14, %v52_v19 }
  0xba   :  { %v57_v22 = vsel %vm55_vm1, %v56_v20, %v54_v21  ;;  %v119_v23 = vpop.eup %118 }
  0xbb   :  { %v65_v24 = vadd.f32 1e-06, %v57_v22  ;;  %v59_v25 = vmul.f32 %v119_v23, %v50_v17 }
  0xbd   :  { %120 = vrcp.f32 %v65_v24  ;;  %v61_v27 = vsel %vm60_vm2, %v50_v17, %v59_v25 }
  0xbe   :  { %v64_v28 = vsel %vm62_vm3, %v63_v26, %v61_v27 }
  0xbf   :  { %v66_v29 = vadd.f32 1e-06, %v64_v28 }
  0xc1   :  { %122 = vrcp.f32 %v66_v29 }
  0xc7   :  { %v121_v31 = vpop.eup %120 }
  0xc8   :  { %v79_v33 = vmul.f32 %v121_v31, %v110_v30 }
  0xca   :  { %v81_v35 = vmul.f32 %v79_v33, %v69_v32 }
  0xcb   :  { %v123_v36 = vpop.eup %122 }
  0xcc   :  { %v89_v37 = vadd.f32 %v111_v34, %v81_v35  ;;  %v80_v39 = vmul.f32 %v123_v36, %v110_v30 }
  0xce   :  { %91 = vst [vmem:[#allocation5] sm:$0xff] %v89_v37  ;;  %v82_v40 = vmul.f32 %v80_v39, %v70_v38 }
  0xd0   :  { %v90_v41 = vadd.f32 %v111_v34, %v82_v40 }
  0xd2   :  { %92 = vst [vmem:[#allocation5 + $0x8] sm:$0xff] %v90_v41 }
  0xd3   :  { %157 = shalt.err (!%p154_p12)
}
  0xd4   :  { %s158_s5 = scalar_lea.hbm %s235_s3, 256 }
  0xd5   :  { %p159_p13 = scmp.ne.s32.totalorder %s235_s3, %s158_s5  ;;  %p162_p0 = scmp.lt.u32.totalorder %s158_s5, %s235_s3 }
  0xd7   :  { %p164_p1 = pnand %p162_p0, %p159_p13 }
  0xd9   :  { %167 = shalt.err (!%p164_p1)
}
  0xda   :  { %104 = dma.vmem_to_hbm [thread:$0]  %s99_s30, 256, %s235_s3, [#allocation4], %s173_s22, %s173_s22, %s174_s23  }
  0xdb   :  { %170 = dma.done.wait [#allocation4], 256  }
  0xdc   :  { %171 = vsyncadd [#allocation4], 4294967040 }
  0xdd   :  { %108 = vsyncpa [#allocation3], 1 }
  0xde   :  { %109 = vsyncpa [#allocation4], 1 }

</bundles_post_ra>
